<compile_context>
chip_gen: v5e
topology: v5e:2x2
jax: 0.10.0
libtpu: 0.0.40
codegen_flags: <defaults>
</compile_context>

<pallas_src>
import functools

import jax
import jax.numpy as jnp
import numpy as np
from jax.experimental import pallas as pl
from jax.experimental.pallas import tpu as pltpu


# ---------------------------------------------------------------------------
# Host-side constants (numpy, lru_cached -> constant-folded under jit)
# ---------------------------------------------------------------------------
@functools.lru_cache(maxsize=None)
def _build_masks(H, W, N):
    """[9, N*H*W] f32: mask[tap, n*H*W + y*W + x] = 1 iff (y+dy, x+dx) is in-bounds."""
    HW = H * W
    ys, xs = np.meshgrid(np.arange(H), np.arange(W), indexing="ij")
    ys, xs = ys.reshape(-1), xs.reshape(-1)
    m = np.zeros((9, HW), np.float32)
    tap = 0
    for dy in (-1, 0, 1):
        for dx in (-1, 0, 1):
            valid = (xs + dx >= 0) & (xs + dx < W) & (ys + dy >= 0) & (ys + dy < H)
            m[tap] = valid.astype(np.float32)
            tap += 1
    return np.tile(m, (1, N))                 # per-image tiling along the folded lane axis


@functools.lru_cache(maxsize=None)
def _build_stride2_sel(H, W):
    """[H*W, Ho*Wo] 0/1 matrix picking the even (y, x) positions of ONE image."""
    Ho, Wo = H // 2, W // 2
    S = np.zeros((H * W, Ho * Wo), np.float32)
    for j in range(Ho * Wo):
        yo, xo = divmod(j, Wo)
        S[(2 * yo) * W + 2 * xo, j] = 1.0
    return S


def _prep_weight(w_oihw):
    """OIHW [O, I, 3, 3] -> [O, 9*I]; column = (ky*3 + kx)*I + i (tap-major, channel-minor)."""
    o, i = w_oihw.shape[0], w_oihw.shape[1]
    return jnp.transpose(w_oihw, (0, 2, 3, 1)).reshape(o, 9 * i)


# ---------------------------------------------------------------------------
# Fused ResnetBlock kernel: single grid step, batch folded into lanes, all in VMEM.
# ---------------------------------------------------------------------------
def _resnet_block_kernel(x_ref, w_ref, b_ref, mf_ref, mh_ref, sel_ref, o_ref,
                         tf_ref, th_ref, *, C, N, W, Wo, HW):
    # x_ref  : [C, N*H*W]     channels on sublanes, image-major flat spatial on lanes
    # w_ref  : [5C, 9C]       rows [0:C]=down [C:2C]=in [2C:3C]=block1 [3C:4C]=skep [4C:5C]=block2
    # b_ref  : [5C, 1]
    # mf_ref : [9, N*H*W]     full-res boundary masks (tiled per image)
    # mh_ref : [9, N*Ho*Wo]   half-res boundary masks (tiled per image)
    # sel_ref: [H*W, Ho*Wo]   stride-2 even-position selection for ONE image
    # o_ref  : [C, N*Ho*Wo]
    # tf_ref : VMEM [9C, N*H*W]    full-res tap-stack scratch
    # th_ref : VMEM [9C, N*Ho*Wo]  half-res tap-stack scratch

    def build_taps(inp, masks, row_w, tap_ref):
        # 3x3 / stride-1 / pad-1 neighborhood gather: 9 lane-rolls (XLU) + boundary
        # masks, written straight to VMEM scratch (per-tap vreg liveness, no concat).
        c, lanes = inp.shape
        tap = 0
        for dy in (-1, 0, 1):
            for dx in (-1, 0, 1):
                delta = dy * row_w + dx
                if delta == 0:
                    shifted = inp
                else:
                    shifted = pltpu.roll(inp, shift=(-delta) % lanes, axis=1)
                    shifted = shifted * masks[tap:tap + 1, :]   # zero wrapped / OOB taps
                tap_ref[tap * c:(tap + 1) * c, :] = shifted
                tap += 1
        return tap_ref[...]                                     # [9c, lanes]

    mf = mf_ref[...]
    mh = mh_ref[...]
    sel = sel_ref[...]
    x = x_ref[...]

    # ---- Downsample conv (stride 2, pad 1): stride-1 conv + per-image even pick ----
    stack_f = build_taps(x, mf, W, tf_ref)                                     # [9C, N*HW]
    y = jnp.dot(w_ref[0:C, :], stack_f,
                preferred_element_type=jnp.float32) + b_ref[0:C, :]            # [C, N*HW]
    # TODO(synk): at larger C/H replace this selection matmul with a reshape-based
    # even-row/col pick; at C=8 the MXU has huge slack so it is effectively free.
    xd = jnp.concatenate(
        [jnp.dot(y[:, n * HW:(n + 1) * HW], sel, preferred_element_type=jnp.float32)
         for n in range(N)], axis=1)                                           # [C, N*HoWo]

    # ---- in_conv ----
    stack_1 = build_taps(xd, mh, Wo, th_ref)
    x2 = jnp.dot(w_ref[C:2 * C, :], stack_1,
                 preferred_element_type=jnp.float32) + b_ref[C:2 * C, :]

    # ---- block1 + skep share x2's tap stack: ONE fused [2C, 9C] matmul ----
    stack_2 = build_taps(x2, mh, Wo, th_ref)
    hs = jnp.dot(w_ref[2 * C:4 * C, :], stack_2,
                 preferred_element_type=jnp.float32) + b_ref[2 * C:4 * C, :]   # [2C, N*HoWo]
    h = jnp.maximum(hs[0:C, :], 0.0)       # block1 + ReLU
    skip = hs[C:2 * C, :]                  # skep(x2)

    # ---- block2 + residual ----
    stack_3 = build_taps(h, mh, Wo, th_ref)
    out = jnp.dot(w_ref[4 * C:5 * C, :], stack_3,
                  preferred_element_type=jnp.float32) + b_ref[4 * C:5 * C, :] + skip

    o_ref[...] = out.astype(o_ref.dtype)   # [C, N*Ho*Wo]: lane-dense (128 wide at N=2)


# ---------------------------------------------------------------------------
# Wrapper: NCHW in / NCHW out.  Jitted so masks/sel/weight-packing constant-fold.
# ---------------------------------------------------------------------------
@jax.jit
def resnet_block_forward(x_nchw, params):
    N, C, H, W = x_nchw.shape
    Ho, Wo = H // 2, W // 2
    Cout = params["in_w"].shape[0]
    assert H % 2 == 0 and W % 2 == 0, "H, W must be even (stride-2 downsample)"
    assert Cout == C, "sk=False path requires in_c == out_c (skep applied to in_conv output)"
    assert C % 8 == 0, "channel count must be a multiple of 8 (sublane tile)"

    # [C, N*H*W]: channels on sublanes, image-major flattened spatial on lanes.
    x_flat = jnp.transpose(x_nchw, (1, 0, 2, 3)).reshape(C, N * H * W)

    # Weight/bias packing (constant-folds per trace).
    # Rows: [0:C]=down  [C:2C]=in  [2C:3C]=block1  [3C:4C]=skep  [4C:5C]=block2
    w_all = jnp.concatenate([_prep_weight(params[k]) for k in
                             ("down_w", "in_w", "b1_w", "skep_w", "b2_w")], axis=0)
    b_all = jnp.concatenate([params[k].reshape(-1, 1) for k in
                             ("down_b", "in_b", "b1_b", "skep_b", "b2_b")], axis=0)

    m_full = jnp.asarray(_build_masks(H, W, N))       # [9, N*H*W]
    m_half = jnp.asarray(_build_masks(Ho, Wo, N))     # [9, N*Ho*Wo]
    sel = jnp.asarray(_build_stride2_sel(H, W))       # [H*W, Ho*Wo]

    kernel = functools.partial(_resnet_block_kernel, C=C, N=N, W=W, Wo=Wo, HW=H * W)

    out_flat = pl.pallas_call(
        kernel,
        out_shape=jax.ShapeDtypeStruct((C, N * Ho * Wo), x_nchw.dtype),
        grid=(1,),
        in_specs=[
            pl.BlockSpec((C, N * H * W), lambda i: (0, 0)),
            pl.BlockSpec(w_all.shape, lambda i: (0, 0)),
            pl.BlockSpec(b_all.shape, lambda i: (0, 0)),
            pl.BlockSpec(m_full.shape, lambda i: (0, 0)),
            pl.BlockSpec(m_half.shape, lambda i: (0, 0)),
            pl.BlockSpec(sel.shape, lambda i: (0, 0)),
        ],
        out_specs=pl.BlockSpec((C, N * Ho * Wo), lambda i: (0, 0)),
        scratch_shapes=[
            pltpu.VMEM((9 * C, N * H * W), jnp.float32),     # full-res tap stack
            pltpu.VMEM((9 * C, N * Ho * Wo), jnp.float32),   # half-res tap stack
        ],
        compiler_params=pltpu.CompilerParams(dimension_semantics=("arbitrary",)),
    )(x_flat, w_all, b_all, m_full, m_half, sel)

    # Free layout plumbing back to NCHW.
    return jnp.transpose(out_flat.reshape(C, N, Ho, Wo), (1, 0, 2, 3))


# ---------------------------------------------------------------------------
# Pure-JAX reference (NCHW, same math) for correctness checking
# ---------------------------------------------------------------------------
def _ref_conv(x, w, b, stride=1):
    y = jax.lax.conv_general_dilated(
        x, w, (stride, stride), ((1, 1), (1, 1)),
        dimension_numbers=("NCHW", "OIHW", "NCHW"))
    return y + b[None, :, None, None]


def resnet_block_ref(x, p):
    x = _ref_conv(x, p["down_w"], p["down_b"], stride=2)
    x = _ref_conv(x, p["in_w"], p["in_b"])
    h = jnp.maximum(_ref_conv(x, p["b1_w"], p["b1_b"]), 0.0)
    h = _ref_conv(h, p["b2_w"], p["b2_b"])
    return h + _ref_conv(x, p["skep_w"], p["skep_b"])


# ---------------------------------------------------------------------------
if __name__ == "__main__":
    in_c = out_c = 8
    N, H, W = 2, 16, 16

    key = jax.random.PRNGKey(0)
    ks = jax.random.split(key, 11)

    def winit(k, o, i):
        return jax.random.normal(k, (o, i, 3, 3), jnp.float32) * 0.05

    def binit(k, o):
        return jax.random.normal(k, (o,), jnp.float32) * 0.05

    params = {
        "down_w": winit(ks[0], in_c, in_c),   "down_b": binit(ks[1], in_c),
        "in_w":   winit(ks[2], out_c, in_c),  "in_b":   binit(ks[3], out_c),
        "b1_w":   winit(ks[4], out_c, out_c), "b1_b":   binit(ks[5], out_c),
        "b2_w":   winit(ks[6], out_c, out_c), "b2_b":   binit(ks[7], out_c),
        "skep_w": winit(ks[8], out_c, in_c),  "skep_b": binit(ks[9], out_c),
    }

    x = jax.random.normal(ks[10], (N, in_c, H, W), jnp.float32)

    out = jax.block_until_ready(resnet_block_forward(x, params))
    ref = jax.block_until_ready(resnet_block_ref(x, params))

    assert out.shape == (N, out_c, H // 2, W // 2), out.shape
    np.testing.assert_allclose(np.asarray(out), np.asarray(ref), atol=1e-4, rtol=1e-4)

    print("KERNEL_OK")
</pallas_src>

<mosaic_0001>
module attributes {stable_mosaic.version = 11 : i64} {
  func.func @_resnet_block_kernel(%arg0: i32, %arg1: memref<8x512xf32, #tpu.memory_space<vmem>>, %arg2: memref<40x72xf32, #tpu.memory_space<vmem>>, %arg3: memref<40x1xf32, #tpu.memory_space<vmem>>, %arg4: memref<9x512xf32, #tpu.memory_space<vmem>>, %arg5: memref<9x128xf32, #tpu.memory_space<vmem>>, %arg6: memref<256x64xf32, #tpu.memory_space<vmem>>, %arg7: memref<8x128xf32, #tpu.memory_space<vmem>>, %arg8: memref<72x512xf32, #tpu.memory_space<vmem>>, %arg9: memref<72x128xf32, #tpu.memory_space<vmem>>) attributes {dimension_semantics = [#tpu.dimension_semantics<arbitrary>], iteration_bounds = array<i64: 1>, scalar_prefetch = 0 : i64, scratch_operands = 2 : i64, tpu.core_type = #tpu.core_type<tc>, window_params = [{pipeline_mode = #tpu.pipeline_mode<synchronous>, transform_indices = @transform_0, window_bounds = array<i64: 8, 512>}, {pipeline_mode = #tpu.pipeline_mode<synchronous>, transform_indices = @transform_1, window_bounds = array<i64: 40, 72>}, {pipeline_mode = #tpu.pipeline_mode<synchronous>, transform_indices = @transform_2, window_bounds = array<i64: 40, 1>}, {pipeline_mode = #tpu.pipeline_mode<synchronous>, transform_indices = @transform_3, window_bounds = array<i64: 9, 512>}, {pipeline_mode = #tpu.pipeline_mode<synchronous>, transform_indices = @transform_4, window_bounds = array<i64: 9, 128>}, {pipeline_mode = #tpu.pipeline_mode<synchronous>, transform_indices = @transform_5, window_bounds = array<i64: 256, 64>}, {pipeline_mode = #tpu.pipeline_mode<synchronous>, transform_indices = @transform_6, window_bounds = array<i64: 8, 128>}]} {
    %c0 = arith.constant 0 : index
    %c0_0 = arith.constant 0 : index
    %0 = vector.load %arg4[%c0, %c0_0] : memref<9x512xf32, #tpu.memory_space<vmem>>, vector<9x512xf32>
    %c0_1 = arith.constant 0 : index
    %c0_2 = arith.constant 0 : index
    %1 = vector.load %arg5[%c0_1, %c0_2] : memref<9x128xf32, #tpu.memory_space<vmem>>, vector<9x128xf32>
    %c0_3 = arith.constant 0 : index
    %c0_4 = arith.constant 0 : index
    %2 = vector.load %arg6[%c0_3, %c0_4] : memref<256x64xf32, #tpu.memory_space<vmem>>, vector<256x64xf32>
    %c0_5 = arith.constant 0 : index
    %c0_6 = arith.constant 0 : index
    %3 = vector.load %arg1[%c0_5, %c0_6] : memref<8x512xf32, #tpu.memory_space<vmem>>, vector<8x512xf32>
    %c17_i32 = arith.constant 17 : i32
    %4 = tpu.dynamic_rotate %3 by %c17_i32 dim 1 : vector<8x512xf32>, i32 -> vector<8x512xf32>
    %5 = vector.extract_strided_slice %0 {offsets = [0, 0], sizes = [1, 512], strides = [1, 1]} : vector<9x512xf32> to vector<1x512xf32>
    %6 = vector.broadcast %5 : vector<1x512xf32> to vector<8x512xf32>
    %7 = arith.mulf %4, %6 : vector<8x512xf32>
    %c0_7 = arith.constant 0 : index
    %c0_8 = arith.constant 0 : index
    %8 = vector.load %arg8[%c0_7, %c0_8] : memref<72x512xf32, #tpu.memory_space<vmem>>, vector<8x512xf32>
    tpu.vector_store %arg8[%c0_7, %c0_8], %7 {strides = array<i32>} : memref<72x512xf32, #tpu.memory_space<vmem>>, vector<8x512xf32>,
    %c16_i32 = arith.constant 16 : i32
    %9 = tpu.dynamic_rotate %3 by %c16_i32 dim 1 : vector<8x512xf32>, i32 -> vector<8x512xf32>
    %10 = vector.extract_strided_slice %0 {offsets = [1, 0], sizes = [1, 512], strides = [1, 1]} : vector<9x512xf32> to vector<1x512xf32>
    %11 = vector.broadcast %10 : vector<1x512xf32> to vector<8x512xf32>
    %12 = arith.mulf %9, %11 : vector<8x512xf32>
    %c8 = arith.constant 8 : index
    %c0_9 = arith.constant 0 : index
    %13 = vector.load %arg8[%c8, %c0_9] : memref<72x512xf32, #tpu.memory_space<vmem>>, vector<8x512xf32>
    tpu.vector_store %arg8[%c8, %c0_9], %12 {strides = array<i32>} : memref<72x512xf32, #tpu.memory_space<vmem>>, vector<8x512xf32>,
    %c15_i32 = arith.constant 15 : i32
    %14 = tpu.dynamic_rotate %3 by %c15_i32 dim 1 : vector<8x512xf32>, i32 -> vector<8x512xf32>
    %15 = vector.extract_strided_slice %0 {offsets = [2, 0], sizes = [1, 512], strides = [1, 1]} : vector<9x512xf32> to vector<1x512xf32>
    %16 = vector.broadcast %15 : vector<1x512xf32> to vector<8x512xf32>
    %17 = arith.mulf %14, %16 : vector<8x512xf32>
    %c16 = arith.constant 16 : index
    %c0_10 = arith.constant 0 : index
    %18 = vector.load %arg8[%c16, %c0_10] : memref<72x512xf32, #tpu.memory_space<vmem>>, vector<8x512xf32>
    tpu.vector_store %arg8[%c16, %c0_10], %17 {strides = array<i32>} : memref<72x512xf32, #tpu.memory_space<vmem>>, vector<8x512xf32>,
    %c1_i32 = arith.constant 1 : i32
    %19 = tpu.dynamic_rotate %3 by %c1_i32 dim 1 : vector<8x512xf32>, i32 -> vector<8x512xf32>
    %20 = vector.extract_strided_slice %0 {offsets = [3, 0], sizes = [1, 512], strides = [1, 1]} : vector<9x512xf32> to vector<1x512xf32>
    %21 = vector.broadcast %20 : vector<1x512xf32> to vector<8x512xf32>
    %22 = arith.mulf %19, %21 : vector<8x512xf32>
    %c24 = arith.constant 24 : index
    %c0_11 = arith.constant 0 : index
    %23 = vector.load %arg8[%c24, %c0_11] : memref<72x512xf32, #tpu.memory_space<vmem>>, vector<8x512xf32>
    tpu.vector_store %arg8[%c24, %c0_11], %22 {strides = array<i32>} : memref<72x512xf32, #tpu.memory_space<vmem>>, vector<8x512xf32>,
    %c32 = arith.constant 32 : index
    %c0_12 = arith.constant 0 : index
    %24 = vector.load %arg8[%c32, %c0_12] : memref<72x512xf32, #tpu.memory_space<vmem>>, vector<8x512xf32>
    tpu.vector_store %arg8[%c32, %c0_12], %3 {strides = array<i32>} : memref<72x512xf32, #tpu.memory_space<vmem>>, vector<8x512xf32>,
    %c511_i32 = arith.constant 511 : i32
    %25 = tpu.dynamic_rotate %3 by %c511_i32 dim 1 : vector<8x512xf32>, i32 -> vector<8x512xf32>
    %26 = vector.extract_strided_slice %0 {offsets = [5, 0], sizes = [1, 512], strides = [1, 1]} : vector<9x512xf32> to vector<1x512xf32>
    %27 = vector.broadcast %26 : vector<1x512xf32> to vector<8x512xf32>
    %28 = arith.mulf %25, %27 : vector<8x512xf32>
    %c40 = arith.constant 40 : index
    %c0_13 = arith.constant 0 : index
    %29 = vector.load %arg8[%c40, %c0_13] : memref<72x512xf32, #tpu.memory_space<vmem>>, vector<8x512xf32>
    tpu.vector_store %arg8[%c40, %c0_13], %28 {strides = array<i32>} : memref<72x512xf32, #tpu.memory_space<vmem>>, vector<8x512xf32>,
    %c497_i32 = arith.constant 497 : i32
    %30 = tpu.dynamic_rotate %3 by %c497_i32 dim 1 : vector<8x512xf32>, i32 -> vector<8x512xf32>
    %31 = vector.extract_strided_slice %0 {offsets = [6, 0], sizes = [1, 512], strides = [1, 1]} : vector<9x512xf32> to vector<1x512xf32>
    %32 = vector.broadcast %31 : vector<1x512xf32> to vector<8x512xf32>
    %33 = arith.mulf %30, %32 : vector<8x512xf32>
    %c48 = arith.constant 48 : index
    %c0_14 = arith.constant 0 : index
    %34 = vector.load %arg8[%c48, %c0_14] : memref<72x512xf32, #tpu.memory_space<vmem>>, vector<8x512xf32>
    tpu.vector_store %arg8[%c48, %c0_14], %33 {strides = array<i32>} : memref<72x512xf32, #tpu.memory_space<vmem>>, vector<8x512xf32>,
    %c496_i32 = arith.constant 496 : i32
    %35 = tpu.dynamic_rotate %3 by %c496_i32 dim 1 : vector<8x512xf32>, i32 -> vector<8x512xf32>
    %36 = vector.extract_strided_slice %0 {offsets = [7, 0], sizes = [1, 512], strides = [1, 1]} : vector<9x512xf32> to vector<1x512xf32>
    %37 = vector.broadcast %36 : vector<1x512xf32> to vector<8x512xf32>
    %38 = arith.mulf %35, %37 : vector<8x512xf32>
    %c56 = arith.constant 56 : index
    %c0_15 = arith.constant 0 : index
    %39 = vector.load %arg8[%c56, %c0_15] : memref<72x512xf32, #tpu.memory_space<vmem>>, vector<8x512xf32>
    tpu.vector_store %arg8[%c56, %c0_15], %38 {strides = array<i32>} : memref<72x512xf32, #tpu.memory_space<vmem>>, vector<8x512xf32>,
    %c495_i32 = arith.constant 495 : i32
    %40 = tpu.dynamic_rotate %3 by %c495_i32 dim 1 : vector<8x512xf32>, i32 -> vector<8x512xf32>
    %41 = vector.extract_strided_slice %0 {offsets = [8, 0], sizes = [1, 512], strides = [1, 1]} : vector<9x512xf32> to vector<1x512xf32>
    %42 = vector.broadcast %41 : vector<1x512xf32> to vector<8x512xf32>
    %43 = arith.mulf %40, %42 : vector<8x512xf32>
    %c64 = arith.constant 64 : index
    %c0_16 = arith.constant 0 : index
    %44 = vector.load %arg8[%c64, %c0_16] : memref<72x512xf32, #tpu.memory_space<vmem>>, vector<8x512xf32>
    tpu.vector_store %arg8[%c64, %c0_16], %43 {strides = array<i32>} : memref<72x512xf32, #tpu.memory_space<vmem>>, vector<8x512xf32>,
    %c0_17 = arith.constant 0 : index
    %c0_18 = arith.constant 0 : index
    %45 = vector.load %arg8[%c0_17, %c0_18] : memref<72x512xf32, #tpu.memory_space<vmem>>, vector<72x512xf32>
    %c0_19 = arith.constant 0 : index
    %c0_20 = arith.constant 0 : index
    %46 = vector.load %arg2[%c0_19, %c0_20] : memref<40x72xf32, #tpu.memory_space<vmem>>, vector<8x72xf32>
    %cst = arith.constant dense<0.000000e+00> : vector<8x512xf32>
    %47 = tpu.matmul %46, %45, %cst {dimension_numbers = #tpu.dot_dimension_numbers<[1], [0], [0], [1], [0, 0, 1, 1], [], []>} : vector<8x72xf32>, vector<72x512xf32>, vector<8x512xf32> -> vector<8x512xf32>
    %c0_21 = arith.constant 0 : index
    %c0_22 = arith.constant 0 : index
    %48 = vector.load %arg3[%c0_21, %c0_22] : memref<40x1xf32, #tpu.memory_space<vmem>>, vector<8x1xf32>
    %49 = vector.broadcast %48 : vector<8x1xf32> to vector<8x512xf32>
    %50 = arith.addf %47, %49 : vector<8x512xf32>
    %51 = vector.extract_strided_slice %50 {offsets = [0, 0], sizes = [8, 256], strides = [1, 1]} : vector<8x512xf32> to vector<8x256xf32>
    %cst_23 = arith.constant dense<0.000000e+00> : vector<8x64xf32>
    %52 = tpu.matmul %51, %2, %cst_23 {dimension_numbers = #tpu.dot_dimension_numbers<[1], [0], [0], [1], [0, 0, 1, 1], [], []>} : vector<8x256xf32>, vector<256x64xf32>, vector<8x64xf32> -> vector<8x64xf32>
    %53 = vector.extract_strided_slice %50 {offsets = [0, 256], sizes = [8, 256], strides = [1, 1]} : vector<8x512xf32> to vector<8x256xf32>
    %cst_24 = arith.constant dense<0.000000e+00> : vector<8x64xf32>
    %54 = tpu.matmul %53, %2, %cst_24 {dimension_numbers = #tpu.dot_dimension_numbers<[1], [0], [0], [1], [0, 0, 1, 1], [], []>} : vector<8x256xf32>, vector<256x64xf32>, vector<8x64xf32> -> vector<8x64xf32>
    %55 = tpu.concatenate %52, %54 in 1 : vector<8x64xf32>, vector<8x64xf32> -> vector<8x128xf32>
    %c9_i32 = arith.constant 9 : i32
    %56 = tpu.dynamic_rotate %55 by %c9_i32 dim 1 : vector<8x128xf32>, i32 -> vector<8x128xf32>
    %57 = vector.extract_strided_slice %1 {offsets = [0, 0], sizes = [1, 128], strides = [1, 1]} : vector<9x128xf32> to vector<1x128xf32>
    %58 = vector.broadcast %57 : vector<1x128xf32> to vector<8x128xf32>
    %59 = arith.mulf %56, %58 : vector<8x128xf32>
    %c0_25 = arith.constant 0 : index
    %c0_26 = arith.constant 0 : index
    %60 = vector.load %arg9[%c0_25, %c0_26] : memref<72x128xf32, #tpu.memory_space<vmem>>, vector<8x128xf32>
    tpu.vector_store %arg9[%c0_25, %c0_26], %59 {strides = array<i32>} : memref<72x128xf32, #tpu.memory_space<vmem>>, vector<8x128xf32>,
    %c8_i32 = arith.constant 8 : i32
    %61 = tpu.dynamic_rotate %55 by %c8_i32 dim 1 : vector<8x128xf32>, i32 -> vector<8x128xf32>
    %62 = vector.extract_strided_slice %1 {offsets = [1, 0], sizes = [1, 128], strides = [1, 1]} : vector<9x128xf32> to vector<1x128xf32>
    %63 = vector.broadcast %62 : vector<1x128xf32> to vector<8x128xf32>
    %64 = arith.mulf %61, %63 : vector<8x128xf32>
    %c8_27 = arith.constant 8 : index
    %c0_28 = arith.constant 0 : index
    %65 = vector.load %arg9[%c8_27, %c0_28] : memref<72x128xf32, #tpu.memory_space<vmem>>, vector<8x128xf32>
    tpu.vector_store %arg9[%c8_27, %c0_28], %64 {strides = array<i32>} : memref<72x128xf32, #tpu.memory_space<vmem>>, vector<8x128xf32>,
    %c7_i32 = arith.constant 7 : i32
    %66 = tpu.dynamic_rotate %55 by %c7_i32 dim 1 : vector<8x128xf32>, i32 -> vector<8x128xf32>
    %67 = vector.extract_strided_slice %1 {offsets = [2, 0], sizes = [1, 128], strides = [1, 1]} : vector<9x128xf32> to vector<1x128xf32>
    %68 = vector.broadcast %67 : vector<1x128xf32> to vector<8x128xf32>
    %69 = arith.mulf %66, %68 : vector<8x128xf32>
    %c16_29 = arith.constant 16 : index
    %c0_30 = arith.constant 0 : index
    %70 = vector.load %arg9[%c16_29, %c0_30] : memref<72x128xf32, #tpu.memory_space<vmem>>, vector<8x128xf32>
    tpu.vector_store %arg9[%c16_29, %c0_30], %69 {strides = array<i32>} : memref<72x128xf32, #tpu.memory_space<vmem>>, vector<8x128xf32>,
    %c1_i32_31 = arith.constant 1 : i32
    %71 = tpu.dynamic_rotate %55 by %c1_i32_31 dim 1 : vector<8x128xf32>, i32 -> vector<8x128xf32>
    %72 = vector.extract_strided_slice %1 {offsets = [3, 0], sizes = [1, 128], strides = [1, 1]} : vector<9x128xf32> to vector<1x128xf32>
    %73 = vector.broadcast %72 : vector<1x128xf32> to vector<8x128xf32>
    %74 = arith.mulf %71, %73 : vector<8x128xf32>
    %c24_32 = arith.constant 24 : index
    %c0_33 = arith.constant 0 : index
    %75 = vector.load %arg9[%c24_32, %c0_33] : memref<72x128xf32, #tpu.memory_space<vmem>>, vector<8x128xf32>
    tpu.vector_store %arg9[%c24_32, %c0_33], %74 {strides = array<i32>} : memref<72x128xf32, #tpu.memory_space<vmem>>, vector<8x128xf32>,
    %c32_34 = arith.constant 32 : index
    %c0_35 = arith.constant 0 : index
    %76 = vector.load %arg9[%c32_34, %c0_35] : memref<72x128xf32, #tpu.memory_space<vmem>>, vector<8x128xf32>
    tpu.vector_store %arg9[%c32_34, %c0_35], %55 {strides = array<i32>} : memref<72x128xf32, #tpu.memory_space<vmem>>, vector<8x128xf32>,
    %c127_i32 = arith.constant 127 : i32
    %77 = tpu.dynamic_rotate %55 by %c127_i32 dim 1 : vector<8x128xf32>, i32 -> vector<8x128xf32>
    %78 = vector.extract_strided_slice %1 {offsets = [5, 0], sizes = [1, 128], strides = [1, 1]} : vector<9x128xf32> to vector<1x128xf32>
    %79 = vector.broadcast %78 : vector<1x128xf32> to vector<8x128xf32>
    %80 = arith.mulf %77, %79 : vector<8x128xf32>
    %c40_36 = arith.constant 40 : index
    %c0_37 = arith.constant 0 : index
    %81 = vector.load %arg9[%c40_36, %c0_37] : memref<72x128xf32, #tpu.memory_space<vmem>>, vector<8x128xf32>
    tpu.vector_store %arg9[%c40_36, %c0_37], %80 {strides = array<i32>} : memref<72x128xf32, #tpu.memory_space<vmem>>, vector<8x128xf32>,
    %c121_i32 = arith.constant 121 : i32
    %82 = tpu.dynamic_rotate %55 by %c121_i32 dim 1 : vector<8x128xf32>, i32 -> vector<8x128xf32>
    %83 = vector.extract_strided_slice %1 {offsets = [6, 0], sizes = [1, 128], strides = [1, 1]} : vector<9x128xf32> to vector<1x128xf32>
    %84 = vector.broadcast %83 : vector<1x128xf32> to vector<8x128xf32>
    %85 = arith.mulf %82, %84 : vector<8x128xf32>
    %c48_38 = arith.constant 48 : index
    %c0_39 = arith.constant 0 : index
    %86 = vector.load %arg9[%c48_38, %c0_39] : memref<72x128xf32, #tpu.memory_space<vmem>>, vector<8x128xf32>
    tpu.vector_store %arg9[%c48_38, %c0_39], %85 {strides = array<i32>} : memref<72x128xf32, #tpu.memory_space<vmem>>, vector<8x128xf32>,
    %c120_i32 = arith.constant 120 : i32
    %87 = tpu.dynamic_rotate %55 by %c120_i32 dim 1 : vector<8x128xf32>, i32 -> vector<8x128xf32>
    %88 = vector.extract_strided_slice %1 {offsets = [7, 0], sizes = [1, 128], strides = [1, 1]} : vector<9x128xf32> to vector<1x128xf32>
    %89 = vector.broadcast %88 : vector<1x128xf32> to vector<8x128xf32>
    %90 = arith.mulf %87, %89 : vector<8x128xf32>
    %c56_40 = arith.constant 56 : index
    %c0_41 = arith.constant 0 : index
    %91 = vector.load %arg9[%c56_40, %c0_41] : memref<72x128xf32, #tpu.memory_space<vmem>>, vector<8x128xf32>
    tpu.vector_store %arg9[%c56_40, %c0_41], %90 {strides = array<i32>} : memref<72x128xf32, #tpu.memory_space<vmem>>, vector<8x128xf32>,
    %c119_i32 = arith.constant 119 : i32
    %92 = tpu.dynamic_rotate %55 by %c119_i32 dim 1 : vector<8x128xf32>, i32 -> vector<8x128xf32>
    %93 = vector.extract_strided_slice %1 {offsets = [8, 0], sizes = [1, 128], strides = [1, 1]} : vector<9x128xf32> to vector<1x128xf32>
    %94 = vector.broadcast %93 : vector<1x128xf32> to vector<8x128xf32>
    %95 = arith.mulf %92, %94 : vector<8x128xf32>
    %c64_42 = arith.constant 64 : index
    %c0_43 = arith.constant 0 : index
    %96 = vector.load %arg9[%c64_42, %c0_43] : memref<72x128xf32, #tpu.memory_space<vmem>>, vector<8x128xf32>
    tpu.vector_store %arg9[%c64_42, %c0_43], %95 {strides = array<i32>} : memref<72x128xf32, #tpu.memory_space<vmem>>, vector<8x128xf32>,
    %c0_44 = arith.constant 0 : index
    %c0_45 = arith.constant 0 : index
    %97 = vector.load %arg9[%c0_44, %c0_45] : memref<72x128xf32, #tpu.memory_space<vmem>>, vector<72x128xf32>
    %c8_46 = arith.constant 8 : index
    %c0_47 = arith.constant 0 : index
    %98 = vector.load %arg2[%c8_46, %c0_47] : memref<40x72xf32, #tpu.memory_space<vmem>>, vector<8x72xf32>
    %cst_48 = arith.constant dense<0.000000e+00> : vector<8x128xf32>
    %99 = tpu.matmul %98, %97, %cst_48 {dimension_numbers = #tpu.dot_dimension_numbers<[1], [0], [0], [1], [0, 0, 1, 1], [], []>} : vector<8x72xf32>, vector<72x128xf32>, vector<8x128xf32> -> vector<8x128xf32>
    %c8_49 = arith.constant 8 : index
    %c0_50 = arith.constant 0 : index
    %100 = vector.load %arg3[%c8_49, %c0_50] : memref<40x1xf32, #tpu.memory_space<vmem>>, vector<8x1xf32>
    %101 = vector.broadcast %100 : vector<8x1xf32> to vector<8x128xf32>
    %102 = arith.addf %99, %101 : vector<8x128xf32>
    %c9_i32_51 = arith.constant 9 : i32
    %103 = tpu.dynamic_rotate %102 by %c9_i32_51 dim 1 : vector<8x128xf32>, i32 -> vector<8x128xf32>
    %104 = vector.extract_strided_slice %1 {offsets = [0, 0], sizes = [1, 128], strides = [1, 1]} : vector<9x128xf32> to vector<1x128xf32>
    %105 = vector.broadcast %104 : vector<1x128xf32> to vector<8x128xf32>
    %106 = arith.mulf %103, %105 : vector<8x128xf32>
    %c0_52 = arith.constant 0 : index
    %c0_53 = arith.constant 0 : index
    %107 = vector.load %arg9[%c0_52, %c0_53] : memref<72x128xf32, #tpu.memory_space<vmem>>, vector<8x128xf32>
    tpu.vector_store %arg9[%c0_52, %c0_53], %106 {strides = array<i32>} : memref<72x128xf32, #tpu.memory_space<vmem>>, vector<8x128xf32>,
    %c8_i32_54 = arith.constant 8 : i32
    %108 = tpu.dynamic_rotate %102 by %c8_i32_54 dim 1 : vector<8x128xf32>, i32 -> vector<8x128xf32>
    %109 = vector.extract_strided_slice %1 {offsets = [1, 0], sizes = [1, 128], strides = [1, 1]} : vector<9x128xf32> to vector<1x128xf32>
    %110 = vector.broadcast %109 : vector<1x128xf32> to vector<8x128xf32>
    %111 = arith.mulf %108, %110 : vector<8x128xf32>
    %c8_55 = arith.constant 8 : index
    %c0_56 = arith.constant 0 : index
    %112 = vector.load %arg9[%c8_55, %c0_56] : memref<72x128xf32, #tpu.memory_space<vmem>>, vector<8x128xf32>
    tpu.vector_store %arg9[%c8_55, %c0_56], %111 {strides = array<i32>} : memref<72x128xf32, #tpu.memory_space<vmem>>, vector<8x128xf32>,
    %c7_i32_57 = arith.constant 7 : i32
    %113 = tpu.dynamic_rotate %102 by %c7_i32_57 dim 1 : vector<8x128xf32>, i32 -> vector<8x128xf32>
    %114 = vector.extract_strided_slice %1 {offsets = [2, 0], sizes = [1, 128], strides = [1, 1]} : vector<9x128xf32> to vector<1x128xf32>
    %115 = vector.broadcast %114 : vector<1x128xf32> to vector<8x128xf32>
    %116 = arith.mulf %113, %115 : vector<8x128xf32>
    %c16_58 = arith.constant 16 : index
    %c0_59 = arith.constant 0 : index
    %117 = vector.load %arg9[%c16_58, %c0_59] : memref<72x128xf32, #tpu.memory_space<vmem>>, vector<8x128xf32>
    tpu.vector_store %arg9[%c16_58, %c0_59], %116 {strides = array<i32>} : memref<72x128xf32, #tpu.memory_space<vmem>>, vector<8x128xf32>,
    %c1_i32_60 = arith.constant 1 : i32
    %118 = tpu.dynamic_rotate %102 by %c1_i32_60 dim 1 : vector<8x128xf32>, i32 -> vector<8x128xf32>
    %119 = vector.extract_strided_slice %1 {offsets = [3, 0], sizes = [1, 128], strides = [1, 1]} : vector<9x128xf32> to vector<1x128xf32>
    %120 = vector.broadcast %119 : vector<1x128xf32> to vector<8x128xf32>
    %121 = arith.mulf %118, %120 : vector<8x128xf32>
    %c24_61 = arith.constant 24 : index
    %c0_62 = arith.constant 0 : index
    %122 = vector.load %arg9[%c24_61, %c0_62] : memref<72x128xf32, #tpu.memory_space<vmem>>, vector<8x128xf32>
    tpu.vector_store %arg9[%c24_61, %c0_62], %121 {strides = array<i32>} : memref<72x128xf32, #tpu.memory_space<vmem>>, vector<8x128xf32>,
    %c32_63 = arith.constant 32 : index
    %c0_64 = arith.constant 0 : index
    %123 = vector.load %arg9[%c32_63, %c0_64] : memref<72x128xf32, #tpu.memory_space<vmem>>, vector<8x128xf32>
    tpu.vector_store %arg9[%c32_63, %c0_64], %102 {strides = array<i32>} : memref<72x128xf32, #tpu.memory_space<vmem>>, vector<8x128xf32>,
    %c127_i32_65 = arith.constant 127 : i32
    %124 = tpu.dynamic_rotate %102 by %c127_i32_65 dim 1 : vector<8x128xf32>, i32 -> vector<8x128xf32>
    %125 = vector.extract_strided_slice %1 {offsets = [5, 0], sizes = [1, 128], strides = [1, 1]} : vector<9x128xf32> to vector<1x128xf32>
    %126 = vector.broadcast %125 : vector<1x128xf32> to vector<8x128xf32>
    %127 = arith.mulf %124, %126 : vector<8x128xf32>
    %c40_66 = arith.constant 40 : index
    %c0_67 = arith.constant 0 : index
    %128 = vector.load %arg9[%c40_66, %c0_67] : memref<72x128xf32, #tpu.memory_space<vmem>>, vector<8x128xf32>
    tpu.vector_store %arg9[%c40_66, %c0_67], %127 {strides = array<i32>} : memref<72x128xf32, #tpu.memory_space<vmem>>, vector<8x128xf32>,
    %c121_i32_68 = arith.constant 121 : i32
    %129 = tpu.dynamic_rotate %102 by %c121_i32_68 dim 1 : vector<8x128xf32>, i32 -> vector<8x128xf32>
    %130 = vector.extract_strided_slice %1 {offsets = [6, 0], sizes = [1, 128], strides = [1, 1]} : vector<9x128xf32> to vector<1x128xf32>
    %131 = vector.broadcast %130 : vector<1x128xf32> to vector<8x128xf32>
    %132 = arith.mulf %129, %131 : vector<8x128xf32>
    %c48_69 = arith.constant 48 : index
    %c0_70 = arith.constant 0 : index
    %133 = vector.load %arg9[%c48_69, %c0_70] : memref<72x128xf32, #tpu.memory_space<vmem>>, vector<8x128xf32>
    tpu.vector_store %arg9[%c48_69, %c0_70], %132 {strides = array<i32>} : memref<72x128xf32, #tpu.memory_space<vmem>>, vector<8x128xf32>,
    %c120_i32_71 = arith.constant 120 : i32
    %134 = tpu.dynamic_rotate %102 by %c120_i32_71 dim 1 : vector<8x128xf32>, i32 -> vector<8x128xf32>
    %135 = vector.extract_strided_slice %1 {offsets = [7, 0], sizes = [1, 128], strides = [1, 1]} : vector<9x128xf32> to vector<1x128xf32>
    %136 = vector.broadcast %135 : vector<1x128xf32> to vector<8x128xf32>
    %137 = arith.mulf %134, %136 : vector<8x128xf32>
    %c56_72 = arith.constant 56 : index
    %c0_73 = arith.constant 0 : index
    %138 = vector.load %arg9[%c56_72, %c0_73] : memref<72x128xf32, #tpu.memory_space<vmem>>, vector<8x128xf32>
    tpu.vector_store %arg9[%c56_72, %c0_73], %137 {strides = array<i32>} : memref<72x128xf32, #tpu.memory_space<vmem>>, vector<8x128xf32>,
    %c119_i32_74 = arith.constant 119 : i32
    %139 = tpu.dynamic_rotate %102 by %c119_i32_74 dim 1 : vector<8x128xf32>, i32 -> vector<8x128xf32>
    %140 = vector.extract_strided_slice %1 {offsets = [8, 0], sizes = [1, 128], strides = [1, 1]} : vector<9x128xf32> to vector<1x128xf32>
    %141 = vector.broadcast %140 : vector<1x128xf32> to vector<8x128xf32>
    %142 = arith.mulf %139, %141 : vector<8x128xf32>
    %c64_75 = arith.constant 64 : index
    %c0_76 = arith.constant 0 : index
    %143 = vector.load %arg9[%c64_75, %c0_76] : memref<72x128xf32, #tpu.memory_space<vmem>>, vector<8x128xf32>
    tpu.vector_store %arg9[%c64_75, %c0_76], %142 {strides = array<i32>} : memref<72x128xf32, #tpu.memory_space<vmem>>, vector<8x128xf32>,
    %c0_77 = arith.constant 0 : index
    %c0_78 = arith.constant 0 : index
    %144 = vector.load %arg9[%c0_77, %c0_78] : memref<72x128xf32, #tpu.memory_space<vmem>>, vector<72x128xf32>
    %c16_79 = arith.constant 16 : index
    %c0_80 = arith.constant 0 : index
    %145 = vector.load %arg2[%c16_79, %c0_80] : memref<40x72xf32, #tpu.memory_space<vmem>>, vector<16x72xf32>
    %cst_81 = arith.constant dense<0.000000e+00> : vector<16x128xf32>
    %146 = tpu.matmul %145, %144, %cst_81 {dimension_numbers = #tpu.dot_dimension_numbers<[1], [0], [0], [1], [0, 0, 1, 1], [], []>} : vector<16x72xf32>, vector<72x128xf32>, vector<16x128xf32> -> vector<16x128xf32>
    %c16_82 = arith.constant 16 : index
    %c0_83 = arith.constant 0 : index
    %147 = vector.load %arg3[%c16_82, %c0_83] : memref<40x1xf32, #tpu.memory_space<vmem>>, vector<16x1xf32>
    %148 = vector.broadcast %147 : vector<16x1xf32> to vector<16x128xf32>
    %149 = arith.addf %146, %148 : vector<16x128xf32>
    %150 = vector.extract_strided_slice %149 {offsets = [0, 0], sizes = [8, 128], strides = [1, 1]} : vector<16x128xf32> to vector<8x128xf32>
    %cst_84 = arith.constant 0.000000e+00 : f32
    %151 = vector.broadcast %cst_84 : f32 to vector<8x128xf32>
    %152 = arith.maximumf %150, %151 : vector<8x128xf32>
    %153 = vector.extract_strided_slice %149 {offsets = [8, 0], sizes = [8, 128], strides = [1, 1]} : vector<16x128xf32> to vector<8x128xf32>
    %c9_i32_85 = arith.constant 9 : i32
    %154 = tpu.dynamic_rotate %152 by %c9_i32_85 dim 1 : vector<8x128xf32>, i32 -> vector<8x128xf32>
    %155 = vector.extract_strided_slice %1 {offsets = [0, 0], sizes = [1, 128], strides = [1, 1]} : vector<9x128xf32> to vector<1x128xf32>
    %156 = vector.broadcast %155 : vector<1x128xf32> to vector<8x128xf32>
    %157 = arith.mulf %154, %156 : vector<8x128xf32>
    %c0_86 = arith.constant 0 : index
    %c0_87 = arith.constant 0 : index
    %158 = vector.load %arg9[%c0_86, %c0_87] : memref<72x128xf32, #tpu.memory_space<vmem>>, vector<8x128xf32>
    tpu.vector_store %arg9[%c0_86, %c0_87], %157 {strides = array<i32>} : memref<72x128xf32, #tpu.memory_space<vmem>>, vector<8x128xf32>,
    %c8_i32_88 = arith.constant 8 : i32
    %159 = tpu.dynamic_rotate %152 by %c8_i32_88 dim 1 : vector<8x128xf32>, i32 -> vector<8x128xf32>
    %160 = vector.extract_strided_slice %1 {offsets = [1, 0], sizes = [1, 128], strides = [1, 1]} : vector<9x128xf32> to vector<1x128xf32>
    %161 = vector.broadcast %160 : vector<1x128xf32> to vector<8x128xf32>
    %162 = arith.mulf %159, %161 : vector<8x128xf32>
    %c8_89 = arith.constant 8 : index
    %c0_90 = arith.constant 0 : index
    %163 = vector.load %arg9[%c8_89, %c0_90] : memref<72x128xf32, #tpu.memory_space<vmem>>, vector<8x128xf32>
    tpu.vector_store %arg9[%c8_89, %c0_90], %162 {strides = array<i32>} : memref<72x128xf32, #tpu.memory_space<vmem>>, vector<8x128xf32>,
    %c7_i32_91 = arith.constant 7 : i32
    %164 = tpu.dynamic_rotate %152 by %c7_i32_91 dim 1 : vector<8x128xf32>, i32 -> vector<8x128xf32>
    %165 = vector.extract_strided_slice %1 {offsets = [2, 0], sizes = [1, 128], strides = [1, 1]} : vector<9x128xf32> to vector<1x128xf32>
    %166 = vector.broadcast %165 : vector<1x128xf32> to vector<8x128xf32>
    %167 = arith.mulf %164, %166 : vector<8x128xf32>
    %c16_92 = arith.constant 16 : index
    %c0_93 = arith.constant 0 : index
    %168 = vector.load %arg9[%c16_92, %c0_93] : memref<72x128xf32, #tpu.memory_space<vmem>>, vector<8x128xf32>
    tpu.vector_store %arg9[%c16_92, %c0_93], %167 {strides = array<i32>} : memref<72x128xf32, #tpu.memory_space<vmem>>, vector<8x128xf32>,
    %c1_i32_94 = arith.constant 1 : i32
    %169 = tpu.dynamic_rotate %152 by %c1_i32_94 dim 1 : vector<8x128xf32>, i32 -> vector<8x128xf32>
    %170 = vector.extract_strided_slice %1 {offsets = [3, 0], sizes = [1, 128], strides = [1, 1]} : vector<9x128xf32> to vector<1x128xf32>
    %171 = vector.broadcast %170 : vector<1x128xf32> to vector<8x128xf32>
    %172 = arith.mulf %169, %171 : vector<8x128xf32>
    %c24_95 = arith.constant 24 : index
    %c0_96 = arith.constant 0 : index
    %173 = vector.load %arg9[%c24_95, %c0_96] : memref<72x128xf32, #tpu.memory_space<vmem>>, vector<8x128xf32>
    tpu.vector_store %arg9[%c24_95, %c0_96], %172 {strides = array<i32>} : memref<72x128xf32, #tpu.memory_space<vmem>>, vector<8x128xf32>,
    %c32_97 = arith.constant 32 : index
    %c0_98 = arith.constant 0 : index
    %174 = vector.load %arg9[%c32_97, %c0_98] : memref<72x128xf32, #tpu.memory_space<vmem>>, vector<8x128xf32>
    tpu.vector_store %arg9[%c32_97, %c0_98], %152 {strides = array<i32>} : memref<72x128xf32, #tpu.memory_space<vmem>>, vector<8x128xf32>,
    %c127_i32_99 = arith.constant 127 : i32
    %175 = tpu.dynamic_rotate %152 by %c127_i32_99 dim 1 : vector<8x128xf32>, i32 -> vector<8x128xf32>
    %176 = vector.extract_strided_slice %1 {offsets = [5, 0], sizes = [1, 128], strides = [1, 1]} : vector<9x128xf32> to vector<1x128xf32>
    %177 = vector.broadcast %176 : vector<1x128xf32> to vector<8x128xf32>
    %178 = arith.mulf %175, %177 : vector<8x128xf32>
    %c40_100 = arith.constant 40 : index
    %c0_101 = arith.constant 0 : index
    %179 = vector.load %arg9[%c40_100, %c0_101] : memref<72x128xf32, #tpu.memory_space<vmem>>, vector<8x128xf32>
    tpu.vector_store %arg9[%c40_100, %c0_101], %178 {strides = array<i32>} : memref<72x128xf32, #tpu.memory_space<vmem>>, vector<8x128xf32>,
    %c121_i32_102 = arith.constant 121 : i32
    %180 = tpu.dynamic_rotate %152 by %c121_i32_102 dim 1 : vector<8x128xf32>, i32 -> vector<8x128xf32>
    %181 = vector.extract_strided_slice %1 {offsets = [6, 0], sizes = [1, 128], strides = [1, 1]} : vector<9x128xf32> to vector<1x128xf32>
    %182 = vector.broadcast %181 : vector<1x128xf32> to vector<8x128xf32>
    %183 = arith.mulf %180, %182 : vector<8x128xf32>
    %c48_103 = arith.constant 48 : index
    %c0_104 = arith.constant 0 : index
    %184 = vector.load %arg9[%c48_103, %c0_104] : memref<72x128xf32, #tpu.memory_space<vmem>>, vector<8x128xf32>
    tpu.vector_store %arg9[%c48_103, %c0_104], %183 {strides = array<i32>} : memref<72x128xf32, #tpu.memory_space<vmem>>, vector<8x128xf32>,
    %c120_i32_105 = arith.constant 120 : i32
    %185 = tpu.dynamic_rotate %152 by %c120_i32_105 dim 1 : vector<8x128xf32>, i32 -> vector<8x128xf32>
    %186 = vector.extract_strided_slice %1 {offsets = [7, 0], sizes = [1, 128], strides = [1, 1]} : vector<9x128xf32> to vector<1x128xf32>
    %187 = vector.broadcast %186 : vector<1x128xf32> to vector<8x128xf32>
    %188 = arith.mulf %185, %187 : vector<8x128xf32>
    %c56_106 = arith.constant 56 : index
    %c0_107 = arith.constant 0 : index
    %189 = vector.load %arg9[%c56_106, %c0_107] : memref<72x128xf32, #tpu.memory_space<vmem>>, vector<8x128xf32>
    tpu.vector_store %arg9[%c56_106, %c0_107], %188 {strides = array<i32>} : memref<72x128xf32, #tpu.memory_space<vmem>>, vector<8x128xf32>,
    %c119_i32_108 = arith.constant 119 : i32
    %190 = tpu.dynamic_rotate %152 by %c119_i32_108 dim 1 : vector<8x128xf32>, i32 -> vector<8x128xf32>
    %191 = vector.extract_strided_slice %1 {offsets = [8, 0], sizes = [1, 128], strides = [1, 1]} : vector<9x128xf32> to vector<1x128xf32>
    %192 = vector.broadcast %191 : vector<1x128xf32> to vector<8x128xf32>
    %193 = arith.mulf %190, %192 : vector<8x128xf32>
    %c64_109 = arith.constant 64 : index
    %c0_110 = arith.constant 0 : index
    %194 = vector.load %arg9[%c64_109, %c0_110] : memref<72x128xf32, #tpu.memory_space<vmem>>, vector<8x128xf32>
    tpu.vector_store %arg9[%c64_109, %c0_110], %193 {strides = array<i32>} : memref<72x128xf32, #tpu.memory_space<vmem>>, vector<8x128xf32>,
    %c0_111 = arith.constant 0 : index
    %c0_112 = arith.constant 0 : index
    %195 = vector.load %arg9[%c0_111, %c0_112] : memref<72x128xf32, #tpu.memory_space<vmem>>, vector<72x128xf32>
    %c32_113 = arith.constant 32 : index
    %c0_114 = arith.constant 0 : index
    %196 = vector.load %arg2[%c32_113, %c0_114] : memref<40x72xf32, #tpu.memory_space<vmem>>, vector<8x72xf32>
    %cst_115 = arith.constant dense<0.000000e+00> : vector<8x128xf32>
    %197 = tpu.matmul %196, %195, %cst_115 {dimension_numbers = #tpu.dot_dimension_numbers<[1], [0], [0], [1], [0, 0, 1, 1], [], []>} : vector<8x72xf32>, vector<72x128xf32>, vector<8x128xf32> -> vector<8x128xf32>
    %c32_116 = arith.constant 32 : index
    %c0_117 = arith.constant 0 : index
    %198 = vector.load %arg3[%c32_116, %c0_117] : memref<40x1xf32, #tpu.memory_space<vmem>>, vector<8x1xf32>
    %199 = vector.broadcast %198 : vector<8x1xf32> to vector<8x128xf32>
    %200 = arith.addf %197, %199 : vector<8x128xf32>
    %201 = arith.addf %200, %153 : vector<8x128xf32>
    %c0_118 = arith.constant 0 : index
    %c0_119 = arith.constant 0 : index
    %202 = vector.load %arg7[%c0_118, %c0_119] : memref<8x128xf32, #tpu.memory_space<vmem>>, vector<8x128xf32>
    tpu.vector_store %arg7[%c0_118, %c0_119], %201 {strides = array<i32>} : memref<8x128xf32, #tpu.memory_space<vmem>>, vector<8x128xf32>,
    return
  }
  func.func @transform_0(%arg0: i32) -> (i32, i32) {
    %c0_i32 = arith.constant 0 : i32
    %c0_i32_0 = arith.constant 0 : i32
    %c0_i32_1 = arith.constant 0 : i32
    return %c0_i32, %c0_i32_0 : i32, i32
  }
  func.func @transform_1(%arg0: i32) -> (i32, i32) {
    %c0_i32 = arith.constant 0 : i32
    %c0_i32_0 = arith.constant 0 : i32
    %c0_i32_1 = arith.constant 0 : i32
    return %c0_i32, %c0_i32_0 : i32, i32
  }
  func.func @transform_2(%arg0: i32) -> (i32, i32) {
    %c0_i32 = arith.constant 0 : i32
    %c0_i32_0 = arith.constant 0 : i32
    %c0_i32_1 = arith.constant 0 : i32
    return %c0_i32, %c0_i32_0 : i32, i32
  }
  func.func @transform_3(%arg0: i32) -> (i32, i32) {
    %c0_i32 = arith.constant 0 : i32
    %c0_i32_0 = arith.constant 0 : i32
    %c0_i32_1 = arith.constant 0 : i32
    return %c0_i32, %c0_i32_0 : i32, i32
  }
  func.func @transform_4(%arg0: i32) -> (i32, i32) {
    %c0_i32 = arith.constant 0 : i32
    %c0_i32_0 = arith.constant 0 : i32
    %c0_i32_1 = arith.constant 0 : i32
    return %c0_i32, %c0_i32_0 : i32, i32
  }
  func.func @transform_5(%arg0: i32) -> (i32, i32) {
    %c0_i32 = arith.constant 0 : i32
    %c0_i32_0 = arith.constant 0 : i32
    %c0_i32_1 = arith.constant 0 : i32
    return %c0_i32, %c0_i32_0 : i32, i32
  }
  func.func @transform_6(%arg0: i32) -> (i32, i32) {
    %c0_i32 = arith.constant 0 : i32
    %c0_i32_0 = arith.constant 0 : i32
    %c0_i32_1 = arith.constant 0 : i32
    return %c0_i32, %c0_i32_0 : i32, i32
  }
}

</mosaic_0001>

<bundles_post_ra>
// kernel: resnet_block_forward.1
= control target key start
LH: loop header
LB: loop body
LE: loop exit
PB: predicated region body
PF: predicated region fallthrough
CT: control target
= control target key end

     0   :  { %s764_s23 = smov 113   ;;  %s765_s24 = smov 112   ;;  %v77_v6 = vlaneseq  ;;  %vm318_vm8 = vcmask 588800   ;;  %vm486_vm9 = vcmask 523264   ;;  %s1334_s0 = inlined_call_operand.vmem [shape: f32[8,512], index: 0, kind: input, shape index: {}]   ;;  %s1335_s3 = inlined_call_operand.vmem [shape: f32[9,512], index: 3, kind: input, shape index: {}]   ;;  %s1336_s2 = inlined_call_operand.vmem [shape: f32[40,1], index: 2, kind: input, shape index: {}]   ;;  %s1337_s5 = inlined_call_operand.vmem [shape: f32[256,64], index: 5, kind: input, shape index: {}]   ;;  %s1338_s1 = inlined_call_operand.vmem [shape: f32[40,72], index: 1, kind: input, shape index: {}]   ;;  %s1339_s4 = inlined_call_operand.vmem [shape: f32[9,128], index: 4, kind: input, shape index: {}]   ;;  %s1340_s6 = inlined_call_operand.vmem [shape: f32[8,128], index: 6, kind: output, shape index: {}]  }
   0x1   :  { %v818_v0 = vld [vmem:[%s1334_s0 + $0x8] sm:$0xff]  ;;  %s766_s25 = smov 111   ;;  %v826_v1 = vld [vmem:[%s1334_s0 + $0x10] sm:$0xff]  ;;  %v834_v2 = vld [vmem:[%s1334_s0] sm:$0xff]  ;;  %s767_s30 = smov 127  }
   0x2   :  { %202 = vrot.lane.b32.xlu2 %v818_v0, %s764_s23  ;;  %227 = vrot.lane.b32.xlu1 %v818_v0, %s765_s24  ;;  %v844_v3 = vld [vmem:[%s1334_s0 + $0x18] sm:$0xff]  ;;  %s768_s9 = smov 1   ;;  %s769_s10 = smov 15   ;;  %v877_v7 = vand.u32 127, %v77_v6  ;;  %v759_v9 = vld [vmem:[%s1335_s3 + $0x20] ss:$0 sm:$0xff] }
   0x3   :  { %252 = vrot.lane.b32.xlu0 %v818_v0, %s766_s25  ;;  %s770_s0 = smov 16   ;;  %s771_s11 = smov 17   ;;  %v760_v14 = vld [vmem:[%s1335_s3 + $0x28] ss:$0 sm:$0xff]  ;;  %v761_v34 = vld [vmem:[%s1335_s3 + $0x30] ss:$0 sm:$0xff] }
   0x4   :  { %vm258_vm0 = vcmp.lt.s32.totalorder %v877_v7, 111  ;;  %vm233_vm1 = vcmp.lt.s32.totalorder %v877_v7, 112  ;;  %v897_v17 = vld [vmem:[%s1335_s3 + $0x8] sm:$0xff]  ;;  %vm208_vm2 = vcmp.lt.s32.totalorder %v877_v7, 113  ;;  %vm183_vm3 = vcmp.lt.s32.totalorder %v877_v7, 127  ;;  %v937_v42 = vld [vmem:[%s1335_s3 + $0x10] sm:$0xff] }
   0x5   :  { %v239_v19 = vperm.slane %v897_v17, 7  ;;  %v214_v23 = vperm.slane %v897_v17, 6  ;;  %v189_v27 = vperm.slane %v897_v17, 5  ;;  %vm154_vm4 = vcmp.lt.s32.totalorder %v877_v7, 1  ;;  %v942_v43 = vld [vmem:[%s1335_s3] sm:$0xff]  ;;  %s776_s26 = smov 119  }
   0x6   :  { %v160_v33 = vperm.slane %v897_v17, 3  ;;  %v240_v44 = vperm.slane %v937_v42, 7  ;;  %v238_v45 = vperm.slane %v942_v43, 7  ;;  %v215_v47 = vperm.slane %v937_v42, 6  ;;  %s777_s27 = smov 7   ;;  %s778_s28 = smov 9  }
   0x7   :  { %v213_v56 = vperm.slane %v942_v43, 6  ;;  %vm129_vm5 = vcmp.lt.s32.totalorder %v877_v7, 15  ;;  %v135_v57 = vperm.slane %v897_v17, 2  ;;  %v188_v59 = vperm.slane %v942_v43, 5  ;;  %s779_s29 = smov 8  }
   0x8   :  { %vm104_vm6 = vcmp.lt.s32.totalorder %v877_v7, 16  ;;  %vm79_vm7 = vcmp.lt.s32.totalorder %v877_v7, 17  ;;  %v47_v7 = vld [vmem:[%s1337_s5 + $0x70] sm:$0xff] }
   0xa   :  { %204 = vrot.lane.b32.xlu2 %v826_v1, %s764_s23  ;;  %229 = vrot.lane.b32.xlu1 %v826_v1, %s765_s24 }
   0xb   :  { %254 = vrot.lane.b32.xlu0 %v826_v1, %s766_s25 }
  0x12   :  { %179 = vrot.lane.b32.xlu1 %v826_v1, %s767_s30  ;;  %250 = vrot.lane.b32.xlu2 %v834_v2, %s766_s25 }
  0x13   :  { %177 = vrot.lane.b32.xlu0 %v818_v0, %s767_s30 }
  0x1a   :  { %146 = vrot.lane.b32.xlu1 %v834_v2, %s768_s9  ;;  %148 = vrot.lane.b32.xlu2 %v818_v0, %s768_s9 }
  0x1b   :  { %256 = vrot.lane.b32.xlu0 %v844_v3, %s766_s25  ;;  %s775_s25 = smov 120  }
  0x22   :  { %231 = vrot.lane.b32.xlu1 %v844_v3, %s765_s24  ;;  %121 = vrot.lane.b32.xlu2 %v834_v2, %s769_s10 }
  0x23   :  { %225 = vrot.lane.b32.xlu0 %v834_v2, %s765_s24  ;;  %s774_s24 = smov 121  }
  0x2a   :  { %200 = vrot.lane.b32.xlu1 %v834_v2, %s764_s23  ;;  %206 = vrot.lane.b32.xlu2 %v844_v3, %s764_s23 }
  0x2b   :  { %123 = vrot.lane.b32.xlu0 %v818_v0, %s769_s10 }
  0x32   :  { %98 = vrot.lane.b32.xlu1 %v818_v0, %s770_s0  ;;  %175 = vrot.lane.b32.xlu2 %v834_v2, %s767_s30 }
  0x33   :  { %96 = vrot.lane.b32.xlu0 %v834_v2, %s770_s0 }
  0x3a   :  { %69 = vrot.lane.b32.xlu1 %v834_v2, %s771_s11  ;;  %71 = vrot.lane.b32.xlu2 %v818_v0, %s771_s11 }
  0x3b   :  { %181 = vrot.lane.b32.xlu0 %v844_v3, %s767_s30 }
  0x42   :  { %152 = vrot.lane.b32.xlu1 %v844_v3, %s768_s9  ;;  %125 = vrot.lane.b32.xlu2 %v826_v1, %s769_s10 }
  0x43   :  { %150 = vrot.lane.b32.xlu0 %v826_v1, %s768_s9 }
  0x4a   :  { %100 = vrot.lane.b32.xlu1 %v826_v1, %s770_s0  ;;  %102 = vrot.lane.b32.xlu2 %v844_v3, %s770_s0 }
  0x4b   :  { %127 = vrot.lane.b32.xlu0 %v844_v3, %s769_s10 }
  0x52   :  { %75 = vrot.lane.b32.xlu1 %v844_v3, %s771_s11 }
  0x53   :  { %73 = vrot.lane.b32.xlu0 %v826_v1, %s771_s11 }
  0x5c   :  { %v875_v4 = vpop.permute.xlu2 %202 }
  0x64   :  { %v205_v5 = vpop.permute.xlu2 %204 }
  0x65   :  { %v210_v24 = vsel %vm208_vm2, %v875_v4, %v205_v5 }
  0x66   :  { %v218_v26 = vmul.f32 %v214_v23, %v210_v24  ;;  %v1013_v23 = vld [vmem:[%s1337_s5 + $0xf0] sm:$0xff] }
  0x6c   :  { %v879_v8 = vpop.permute.xlu2 %250 }
  0x74   :  { %v228_v10 = vpop.permute.xlu1 %227  ;;  %v892_v15 = vpop.permute.xlu2 %148 }
  0x75   :  { %v253_v11 = vpop.permute.xlu0 %252 }
  0x76   :  { %v261_v12 = vsel %vm258_vm0, %v879_v8, %v253_v11 }
  0x77   :  { %v267_v13 = vmul.f32 %v759_v9, %v261_v12  ;;  %v110_v9 = vperm.slane %v897_v17, 1 }
  0x79   :  { %329 = vmatpush.msra.mxu0 %v267_v13 }
  0x7c   :  { %v230_v16 = vpop.permute.xlu1 %229  ;;  %v913_v30 = vpop.permute.xlu2 %121 }
  0x7d   :  { %v255_v18 = vpop.permute.xlu0 %254  ;;  %v235_v20 = vsel %vm233_vm1, %v228_v10, %v230_v16 }
  0x7e   :  { %v260_v21 = vsel %vm258_vm0, %v253_v11, %v255_v18  ;;  %v243_v25 = vmul.f32 %v239_v19, %v235_v20  ;;  %v312_v19 = vld [vmem:[%s1336_s2] sm:$0xff]  ;;  %v1002_v20 = vld [vmem:[%s1337_s5 + $0xf8] sm:$0xff] }
  0x7f   :  { %v268_v22 = vmul.f32 %v760_v14, %v260_v21  ;;  %v85_v14 = vperm.slane %v897_v17, 0  ;;  %422 = vmatpush.msra.mxu1 %v1002_v20 }
  0x81   :  { %349 = vmatpush.msra.mxu3 %v268_v22  ;;  %v772_v22 = vmov 0   ;;  %423 = vmatpush.msra.mxu1 %v1013_v23 }
  0x82   :  { %756 = vset.pattern.permute.xlu2 %v772_v22  ;;  %757 = vset.pattern.permute.xlu0 %v772_v22 }
  0x83   :  { %350 = vmatpush.msra.mxu3 %v243_v25  ;;  %315 = vperm.xlu2 %756, %v312_v19  }
  0x84   :  { %v911_v28 = vpop.permute.xlu1 %179  ;;  %v932_v41 = vpop.permute.xlu2 %206  ;;  %758 = vset.pattern.permute.xlu1 %v772_v22 }
  0x85   :  { %351 = vmatpush.msra.mxu3 %v218_v26  ;;  %v178_v29 = vpop.permute.xlu0 %177  ;;  %v209_v48 = vsel %vm208_vm2, %v205_v5, %v932_v41 }
  0x86   :  { %v185_v31 = vsel %vm183_vm3, %v178_v29, %v911_v28  ;;  %v219_v54 = vmul.f32 %v215_v47, %v209_v48  ;;  %v161_v47 = vperm.slane %v937_v42, 3  ;;  %v1064_v48 = vld [vmem:[%s1337_s5 + $0xd0] sm:$0xff] }
  0x87   :  { %v193_v32 = vmul.f32 %v189_v27, %v185_v31 }
  0x89   :  { %352 = vmatpush.msra.mxu3 %v193_v32 }
  0x8b   :  { %353 = vmatpush.msra.mxu3 %v818_v0 }
  0x8c   :  { %v924_v35 = vpop.permute.xlu1 %146  ;;  %v954_v55 = vpop.permute.xlu2 %175 }
  0x8d   :  { %v257_v36 = vpop.permute.xlu0 %256  ;;  %v157_v37 = vsel %vm154_vm4, %v924_v35, %v892_v15  ;;  %v186_v60 = vsel %vm183_vm3, %v954_v55, %v178_v29 }
  0x8e   :  { %v164_v38 = vmul.f32 %v160_v33, %v157_v37  ;;  %v259_v39 = vsel %vm258_vm0, %v255_v18, %v257_v36  ;;  %v192_v6 = vmul.f32 %v188_v59, %v186_v60  ;;  %v762_v18 = vld [vmem:[%s1335_s3 + $0x38] ss:$0 sm:$0xff]  ;;  %v262_v17 = vsel %vm258_vm0, %v257_v36, %v879_v8  ;;  %v1023_v8 = vld [vmem:[%s1337_s5 + $0xe8] sm:$0xff]  ;;  %v1035_v36 = vld [vmem:[%s1338_s1] sm:$0xff] }
  0x8f   :  { %v269_v40 = vmul.f32 %v761_v34, %v259_v39  ;;  %v270_v33 = vmul.f32 %v762_v18, %v262_v17  ;;  %v1040_v37 = vld [vmem:[%s1337_s5 + $0xe0] sm:$0xff]  ;;  %424 = vmatpush.msra.mxu1 %v1023_v8  ;;  %v1119_v18 = vld [vmem:[%s1337_s5 + $0xa8] sm:$0xff] }
  0x90   :  { %354 = vmatpush.msra.mxu3 %v164_v38  ;;  %v1089_v59 = vld [vmem:[%s1337_s5 + $0xc0] sm:$0xff] }
  0x91   :  { %369 = vmatpush.msra.mxu2 %v269_v40  ;;  %425 = vmatpush.msra.mxu1 %v1040_v37 }
  0x94   :  { %v232_v46 = vpop.permute.xlu1 %231  ;;  %v979_v11 = vpop.permute.xlu2 %71 }
  0x95   :  { %v226_v49 = vpop.permute.xlu0 %225  ;;  %v234_v50 = vsel %vm233_vm1, %v230_v16, %v232_v46  ;;  %v990_v16 = vld [vmem:[%s1335_s3 + $0x18] sm:$0xff] }
  0x96   :  { %v236_v51 = vsel %vm233_vm1, %v226_v49, %v228_v10  ;;  %v244_v52 = vmul.f32 %v240_v44, %v234_v50  ;;  %v241_v26 = vperm.slane %v990_v16, 7  ;;  %v237_v27 = vsel %vm233_vm1, %v232_v46, %v226_v49  ;;  %v1050_v44 = vld [vmem:[%s1337_s5 + $0xd8] sm:$0xff] }
  0x97   :  { %v242_v53 = vmul.f32 %v238_v45, %v236_v51  ;;  %v216_v34 = vperm.slane %v990_v16, 6  ;;  %v191_v40 = vperm.slane %v990_v16, 5  ;;  %426 = vmatpush.msra.mxu1 %v1050_v44 }
  0x98   :  { %370 = vmatpush.msra.mxu2 %v244_v52  ;;  %v245_v39 = vmul.f32 %v241_v26, %v237_v27  ;;  %v1138_v27 = vld [vmem:[%s1337_s5 + $0x98] sm:$0xff] }
  0x99   :  { %330 = vmatpush.msra.mxu0 %v242_v53  ;;  %v136_v53 = vperm.slane %v937_v42, 2  ;;  %427 = vmatpush.msra.mxu1 %v1064_v48 }
  0x9a   :  { %371 = vmatpush.msra.mxu2 %v219_v54  ;;  %v1075_v54 = vld [vmem:[%s1337_s5 + $0xc8] sm:$0xff] }
  0x9b   :  { %428 = vmatpush.msra.mxu1 %v1075_v54 }
  0x9c   :  { %v201_v58 = vpop.permute.xlu1 %200  ;;  %v126_v38 = vpop.permute.xlu2 %125 }
  0x9d   :  { %v963_v61 = vpop.permute.xlu0 %123  ;;  %v211_v62 = vsel %vm208_vm2, %v201_v58, %v875_v4  ;;  %429 = vmatpush.msra.mxu1 %v1089_v59 }
  0x9e   :  { %v132_v63 = vsel %vm129_vm5, %v913_v30, %v963_v61  ;;  %v217_v0 = vmul.f32 %v213_v56, %v211_v62 }
  0x9f   :  { %v139_v5 = vmul.f32 %v135_v57, %v132_v63  ;;  %v111_v63 = vperm.slane %v937_v42, 1 }
  0xa0   :  { %331 = vmatpush.msra.mxu0 %v217_v0  ;;  %v134_v0 = vperm.slane %v942_v43, 2 }
  0xa1   :  { %355 = vmatpush.msra.mxu3 %v139_v5  ;;  %v137_v5 = vperm.slane %v990_v16, 2 }
  0xa2   :  { %332 = vmatpush.msra.mxu0 %v192_v6 }
  0xa4   :  { %v974_v10 = vpop.permute.xlu1 %98  ;;  %333 = vmatpush.msra.mxu0 %v834_v2  ;;  %v190_v2 = vperm.slane %v937_v42, 5  ;;  %v103_v62 = vpop.permute.xlu2 %102 }
  0xa5   :  { %v977_v4 = vpop.permute.xlu0 %96 }
  0xa6   :  { %v107_v12 = vsel %vm104_vm6, %v977_v4, %v974_v10 }
  0xa7   :  { %v114_v13 = vmul.f32 %v110_v9, %v107_v12  ;;  %v108_v9 = vsel %vm104_vm6, %v103_v62, %v977_v4 }
  0xa9   :  { %356 = vmatpush.msra.mxu3 %v114_v13 }
  0xac   :  { %v1007_v21 = vpop.permute.xlu1 %69 }
  0xad   :  { %v182_v24 = vpop.permute.xlu0 %181  ;;  %v82_v25 = vsel %vm79_vm7, %v1007_v21, %v979_v11 }
  0xae   :  { %v184_v29 = vsel %vm183_vm3, %v911_v28, %v182_v24  ;;  %v89_v31 = vmul.f32 %v85_v14, %v82_v25  ;;  %v212_v28 = vsel %vm208_vm2, %v932_v41, %v201_v58  ;;  %v187_v45 = vsel %vm183_vm3, %v182_v24, %v954_v55  ;;  %v1132_v25 = vld [vmem:[%s1337_s5 + $0xa0] sm:$0xff] }
  0xaf   :  { %v194_v32 = vmul.f32 %v190_v2, %v184_v29  ;;  %v159_v41 = vperm.slane %v942_v43, 3  ;;  %v220_v46 = vmul.f32 %v216_v34, %v212_v28  ;;  %v195_v52 = vmul.f32 %v191_v40, %v187_v45  ;;  %v48_v45 = vld [vmem:[%s1337_s5 + $0x78] sm:$0xff] }
  0xb0   :  { %357 = vmatpush.msra.mxu3 %v89_v31  ;;  %v131_v55 = vsel %vm129_vm5, %v963_v61, %v126_v38  ;;  %v1096_v61 = vld [vmem:[%s1337_s5 + $0xb8] sm:$0xff]  ;;  %v109_v14 = vperm.slane %v942_v43, 1  ;;  %v112_v2 = vperm.slane %v990_v16, 1  ;;  %v84_v29 = vperm.slane %v942_v43, 0 }
  0xb1   :  { %372 = vmatpush.msra.mxu2 %v194_v32  ;;  %733 = vmatmul.msk.f32.vlgmr.msra.gmra.mxu3 %vm318_vm8, %v1035_v36  ;;  %v86_v31 = vperm.slane %v937_v42, 0  ;;  %v87_v32 = vperm.slane %v990_v16, 0 }
  0xb2   :  { %389 = vmatpush.msrb.mxu3 %v270_v33  ;;  %430 = vmatpush.msra.mxu1 %v1096_v61  ;;  %v113_v26 = vmul.f32 %v109_v14, %v108_v9  ;;  %v1147_v33 = vld [vmem:[%s1337_s5 + $0x90] sm:$0xff]  ;;  %v31_v9 = vld [vmem:[%s1339_s4] sm:$0xff] }
  0xb3   :  { %373 = vmatpush.msra.mxu2 %v826_v1  ;;  %v162_v1 = vperm.slane %v990_v16, 3  ;;  %v1252_v14 = vperm.slane %v31_v9, 7 }
  0xb4   :  { %390 = vmatpush.msrb.mxu3 %v245_v39  ;;  %v153_v49 = vpop.permute.xlu1 %152 }
  0xb5   :  { %v151_v50 = vpop.permute.xlu0 %150  ;;  %v158_v51 = vsel %vm154_vm4, %v153_v49, %v924_v35 }
  0xb6   :  { %391 = vmatpush.msrb.mxu3 %v220_v46  ;;  %v156_v56 = vsel %vm154_vm4, %v892_v15, %v151_v50  ;;  %v155_v35 = vsel %vm154_vm4, %v151_v50, %v153_v49  ;;  %v163_v57 = vmul.f32 %v159_v41, %v158_v51  ;;  %v140_v15 = vmul.f32 %v136_v53, %v131_v55  ;;  %v38_v41 = vld [vmem:[%s1337_s5 + $0x28] sm:$0xff]  ;;  %v37_v46 = vld [vmem:[%s1337_s5 + $0x20] sm:$0xff] }
  0xb7   :  { %v165_v58 = vmul.f32 %v161_v47, %v156_v56  ;;  %v166_v60 = vmul.f32 %v162_v1, %v155_v35  ;;  %v36_v47 = vld [vmem:[%s1337_s5 + $0x18] sm:$0xff]  ;;  %v50_v49 = vld [vmem:[%s1337_s5 + $0x88] sm:$0xff]  ;;  %v49_v51 = vld [vmem:[%s1337_s5 + $0x80] sm:$0xff] }
  0xb8   :  { %392 = vmatpush.msrb.mxu3 %v195_v52  ;;  %334 = vmatpush.msra.mxu0 %v163_v57  ;;  %v34_v50 = vld [vmem:[%s1337_s5 + $0x8] sm:$0xff]  ;;  %v33_v52 = vld [vmem:[%s1337_s5] sm:$0xff] }
  0xb9   :  { %374 = vmatpush.msra.mxu2 %v165_v58 }
  0xba   :  { %393 = vmatpush.msrb.mxu3 %v844_v3  ;;  %v1105_v3 = vld [vmem:[%s1337_s5 + $0xb0] sm:$0xff] }
  0xbb   :  { %375 = vmatpush.msra.mxu2 %v140_v15  ;;  %431 = vmatpush.msra.mxu1 %v1105_v3 }
  0xbc   :  { %394 = vmatpush.msrb.mxu3 %v166_v60  ;;  %v101_v6 = vpop.permute.xlu1 %100 }
  0xbd   :  { %v128_v12 = vpop.permute.xlu0 %127  ;;  %v106_v13 = vsel %vm104_vm6, %v974_v10, %v101_v6  ;;  %v105_v17 = vsel %vm104_vm6, %v101_v6, %v103_v62  ;;  %432 = vmatpush.msra.mxu1 %v1119_v18  ;;  %v539_v6 = vld [vmem:[%s1336_s2 + $0x8] sm:$0xff] }
  0xbe   :  { %v130_v19 = vsel %vm129_vm5, %v126_v38, %v128_v12  ;;  %v133_v4 = vsel %vm129_vm5, %v128_v12, %v913_v30  ;;  %v115_v10 = vmul.f32 %v111_v63, %v106_v13  ;;  %v116_v30 = vmul.f32 %v112_v2, %v105_v17  ;;  %v1250_v13 = vld [vmem:[%s1339_s4 + $0x8] ss:$0 sm:$0xff] }
  0xbf   :  { %v138_v22 = vmul.f32 %v134_v0, %v133_v4  ;;  %v141_v24 = vmul.f32 %v137_v5, %v130_v19  ;;  %433 = vmatpush.msra.mxu1 %v1132_v25 }
  0xc0   :  { %376 = vmatpush.msra.mxu2 %v115_v10 }
  0xc1   :  { %335 = vmatpush.msra.mxu0 %v138_v22  ;;  %395 = vmatpush.msrb.mxu3 %v141_v24  ;;  %v1259_v22 = vperm.slane %v31_v9, 5 }
  0xc2   :  { %434 = vmatpush.msra.mxu1 %v1138_v27 }
  0xc3   :  { %336 = vmatpush.msra.mxu0 %v113_v26  ;;  %396 = vmatpush.msrb.mxu3 %v116_v30  ;;  %v1261_v26 = vperm.slane %v31_v9, 3 }
  0xc4   :  { %v76_v34 = vpop.permute.xlu1 %75  ;;  %435 = vmatpush.msra.mxu1 %v1147_v33 }
  0xc5   :  { %v74_v28 = vpop.permute.xlu0 %73  ;;  %v83_v43 = vsel %vm79_vm7, %v76_v34, %v1007_v21  ;;  %v45_v21 = vld [vmem:[%s1337_s5 + $0x60] sm:$0xff] }
  0xc6   :  { %v81_v38 = vsel %vm79_vm7, %v979_v11, %v74_v28  ;;  %v80_v42 = vsel %vm79_vm7, %v74_v28, %v76_v34  ;;  %v88_v16 = vmul.f32 %v84_v29, %v83_v43  ;;  %v46_v11 = vld [vmem:[%s1337_s5 + $0x68] sm:$0xff]  ;;  %436 = vmatpush.msra.mxu1 %v50_v49 }
  0xc7   :  { %v90_v39 = vmul.f32 %v86_v31, %v81_v38  ;;  %v91_v40 = vmul.f32 %v87_v32, %v80_v42  ;;  %v1267_v32 = vperm.slane %v31_v9, 1 }
  0xc8   :  { %337 = vmatpush.msra.mxu0 %v88_v16  ;;  %437 = vmatpush.msra.mxu1 %v49_v51  ;;  %v538_v16 = vld [vmem:[%s1338_s1 + $0x8] sm:$0xff] }
  0xc9   :  { %377 = vmatpush.msra.mxu2 %v90_v39  ;;  %397 = vmatpush.msrb.mxu3 %v91_v40 }
  0xca   :  { %732 = vmatmul.msk.f32.vlgmr.msra.gmra.mxu0 %vm318_vm8, %v1035_v36  ;;  %734 = vmatmul.msk.f32.vlgmr.msra.gmra.mxu2 %vm318_vm8, %v1035_v36 }
  0xcb   :  { %735 = vmatmul.msk.f32.vlgmr.msrb.gmra.mxu3 %vm318_vm8, %v1035_v36  ;;  %402 = vmatpush.msrb.mxu0 %v48_v45  ;;  %v44_v36 = vld [vmem:[%s1337_s5 + $0x58] sm:$0xff] }
  0xcc   :  { %442 = vmatpush.msrb.mxu2 %v48_v45  ;;  %462 = vmatpush.msra.mxu3 %v1002_v20  ;;  %v43_v20 = vld [vmem:[%s1337_s5 + $0x50] sm:$0xff] }
  0xcd   :  { %403 = vmatpush.msrb.mxu0 %v47_v7 }
  0xce   :  { %443 = vmatpush.msrb.mxu2 %v47_v7  ;;  %463 = vmatpush.msra.mxu3 %v1013_v23  ;;  %v42_v23 = vld [vmem:[%s1337_s5 + $0x48] sm:$0xff]  ;;  %v612_v7 = vld [vmem:[%s1336_s2 + $0x10] sm:$0xff] }
  0xcf   :  { %404 = vmatpush.msrb.mxu0 %v46_v11 }
  0xd0   :  { %444 = vmatpush.msrb.mxu2 %v46_v11  ;;  %464 = vmatpush.msra.mxu3 %v1023_v8  ;;  %v41_v8 = vld [vmem:[%s1337_s5 + $0x40] sm:$0xff] }
  0xd1   :  { %405 = vmatpush.msrb.mxu0 %v45_v21 }
  0xd2   :  { %445 = vmatpush.msrb.mxu2 %v45_v21  ;;  %465 = vmatpush.msra.mxu3 %v1040_v37  ;;  %v40_v37 = vld [vmem:[%s1337_s5 + $0x38] sm:$0xff] }
  0xd3   :  { %406 = vmatpush.msrb.mxu0 %v44_v36 }
  0xd4   :  { %446 = vmatpush.msrb.mxu2 %v44_v36  ;;  %466 = vmatpush.msra.mxu3 %v1050_v44  ;;  %v39_v44 = vld [vmem:[%s1337_s5 + $0x30] sm:$0xff] }
  0xd5   :  { %407 = vmatpush.msrb.mxu0 %v43_v20 }
  0xd6   :  { %447 = vmatpush.msrb.mxu2 %v43_v20  ;;  %467 = vmatpush.msra.mxu3 %v1064_v48  ;;  %v35_v48 = vld [vmem:[%s1337_s5 + $0x10] sm:$0xff]  ;;  %s773_s5 = smov 64  }
  0xd7   :  { %408 = vmatpush.msrb.mxu0 %v42_v23 }
  0xd8   :  { %448 = vmatpush.msrb.mxu2 %v42_v23  ;;  %468 = vmatpush.msra.mxu3 %v1075_v54 }
  0xd9   :  { %409 = vmatpush.msrb.mxu0 %v41_v8 }
  0xda   :  { %449 = vmatpush.msrb.mxu2 %v41_v8  ;;  %469 = vmatpush.msra.mxu3 %v1089_v59 }
  0xdb   :  { %410 = vmatpush.msrb.mxu0 %v40_v37 }
  0xdc   :  { %450 = vmatpush.msrb.mxu2 %v40_v37  ;;  %470 = vmatpush.msra.mxu3 %v1096_v61 }
  0xdd   :  { %411 = vmatpush.msrb.mxu0 %v39_v44  ;;  %v316_v53 = vpop.permute.xlu2 %315 }
  0xde   :  { %451 = vmatpush.msrb.mxu2 %v39_v44  ;;  %471 = vmatpush.msra.mxu3 %v1105_v3 }
  0xdf   :  { %412 = vmatpush.msrb.mxu0 %v38_v41 }
  0xe0   :  { %452 = vmatpush.msrb.mxu2 %v38_v41  ;;  %472 = vmatpush.msra.mxu3 %v1119_v18  ;;  %v1254_v18 = vperm.slane %v31_v9, 6 }
  0xe1   :  { %413 = vmatpush.msrb.mxu0 %v37_v46 }
  0xe2   :  { %453 = vmatpush.msrb.mxu2 %v37_v46  ;;  %473 = vmatpush.msra.mxu3 %v1132_v25 }
  0xe3   :  { %414 = vmatpush.msrb.mxu0 %v36_v47 }
  0xe4   :  { %454 = vmatpush.msrb.mxu2 %v36_v47  ;;  %474 = vmatpush.msra.mxu3 %v1138_v27  ;;  %v1264_v27 = vperm.slane %v31_v9, 2 }
  0xe5   :  { %415 = vmatpush.msrb.mxu0 %v35_v48 }
  0xe6   :  { %475 = vmatpush.msra.mxu3 %v1147_v33  ;;  %455 = vmatpush.msrb.mxu2 %v35_v48  ;;  %v1269_v33 = vperm.slane %v31_v9, 0 }
  0xe7   :  { %416 = vmatpush.msrb.mxu0 %v34_v50 }
  0xe8   :  { %476 = vmatpush.msra.mxu3 %v50_v49  ;;  %456 = vmatpush.msrb.mxu2 %v34_v50 }
  0xe9   :  { %417 = vmatpush.msrb.mxu0 %v33_v52 }
  0xea   :  { %477 = vmatpush.msra.mxu3 %v49_v51  ;;  %457 = vmatpush.msrb.mxu2 %v33_v52 }
 0x134   :  { %v359_v1 = vpop.f32.mrf.mxu3 }
 0x135   :  { %v360_v54 = vadd.f32 %v359_v1, %v316_v53  ;;  %v611_v1 = vld [vmem:[%s1338_s1 + $0x18] sm:$0xff] }
 0x137   :  { %438 = vmatmul.f32.vlgmr.msra.gmra.mxu1 %v360_v54 }
 0x147   :  { %v339_v55 = vpop.f32.mrf.mxu0 }
 0x148   :  { %v340_v56 = vadd.f32 %v339_v55, %v316_v53 }
 0x14a   :  { %418 = vmatmul.f32.vlgmr.msrb.gmra.mxu0 %v340_v56 }
 0x14d   :  { %v379_v35 = vpop.f32.mrf.mxu2 }
 0x14e   :  { %v380_v57 = vadd.f32 %v379_v35, %v316_v53  ;;  %v399_v58 = vpop.f32.mrf.mxu3 }
 0x14f   :  { %v400_v59 = vadd.f32 %v399_v58, %v316_v53  ;;  %v610_v53 = vld [vmem:[%s1338_s1 + $0x10] sm:$0xff]  ;;  %v697_v58 = vld [vmem:[%s1336_s2 + $0x20] sm:$0xff] }
 0x150   :  { %458 = vmatmul.f32.vlgmr.msrb.gmra.mxu2 %v380_v57  ;;  %v613_v57 = vld [vmem:[%s1336_s2 + $0x18] sm:$0xff] }
 0x151   :  { %478 = vmatmul.f32.vlgmr.msra.gmra.mxu3 %v400_v59 }
 0x1b4   :  { %v439_v63 = vpop.f32.mrf.mxu1 }
 0x1c7   :  { %v419_v62 = vpop.f32.mrf.mxu0 }
 0x1c8   :  { %v440_v0 = vadd.f32 %v439_v63, %v419_v62 }
 0x1d3   :  { %v459_v15 = vpop.f32.mrf.mxu2 }
 0x1d4   :  { %v479_v60 = vpop.f32.mrf.mxu3 }
 0x1d5   :  { %v480_v61 = vadd.f32 %v479_v60, %v459_v15 }
 0x1d7   :  { %483 = vrot.lane.b32.xlu0 %v480_v61, %s773_s5 }
 0x249   :  { %v484_v5 = vpop.permute.xlu0 %483 }
 0x24a   :  { %v487_v3 = vsel %vm486_vm9, %v440_v0, %v484_v5 }
 0x24b   :  { %514 = vrot.lane.b32.xlu0 %v487_v3, %s774_s24  ;;  %519 = vrot.lane.b32.xlu2 %v487_v3, %s775_s25 }
 0x24c   :  { %524 = vrot.lane.b32.xlu1 %v487_v3, %s776_s26 }
 0x253   :  { %498 = vrot.lane.b32.xlu0 %v487_v3, %s777_s27  ;;  %503 = vrot.lane.b32.xlu2 %v487_v3, %s768_s9 }
 0x254   :  { %509 = vrot.lane.b32.xlu1 %v487_v3, %s767_s30 }
 0x25b   :  { %488 = vrot.lane.b32.xlu2 %v487_v3, %s778_s28  ;;  %542 = vperm.xlu0 %757, %v539_v6  }
 0x25c   :  { %493 = vrot.lane.b32.xlu1 %v487_v3, %s779_s29 }
 0x2a5   :  { %v520_v12 = vpop.permute.xlu2 %519 }
 0x2a6   :  { %v522_v17 = vmul.f32 %v1252_v14, %v520_v12 }
 0x2ad   :  { %v504_v24 = vpop.permute.xlu2 %503 }
 0x2ae   :  { %v506_v31 = vmul.f32 %v1261_v26, %v504_v24 }
 0x2b5   :  { %v489_v28 = vpop.permute.xlu2 %488 }
 0x2b6   :  { %v491_v42 = vmul.f32 %v1269_v33, %v489_v28 }
 0x2bd   :  { %v515_v4 = vpop.permute.xlu0 %514 }
 0x2be   :  { %v525_v2 = vpop.permute.xlu1 %524  ;;  %v517_v10 = vmul.f32 %v1254_v18, %v515_v4 }
 0x2bf   :  { %v527_v19 = vmul.f32 %v1250_v13, %v525_v2 }
 0x2c1   :  { %555 = vmatpush.msra.mxu0 %v527_v19  ;;  %v696_v19 = vld [vmem:[%s1338_s1 + $0x20] sm:$0xff] }
 0x2c3   :  { %556 = vmatpush.msra.mxu0 %v522_v17 }
 0x2c5   :  { %557 = vmatpush.msra.mxu0 %v517_v10  ;;  %v499_v29 = vpop.permute.xlu0 %498 }
 0x2c6   :  { %v510_v25 = vpop.permute.xlu1 %509  ;;  %v501_v34 = vmul.f32 %v1264_v27, %v499_v29 }
 0x2c7   :  { %v512_v30 = vmul.f32 %v1259_v22, %v510_v25 }
 0x2c9   :  { %558 = vmatpush.msra.mxu0 %v512_v30 }
 0x2cb   :  { %559 = vmatpush.msra.mxu0 %v487_v3 }
 0x2cd   :  { %560 = vmatpush.msra.mxu0 %v506_v31  ;;  %v543_v39 = vpop.permute.xlu0 %542 }
 0x2ce   :  { %v494_v43 = vpop.permute.xlu1 %493 }
 0x2cf   :  { %v496_v38 = vmul.f32 %v1267_v32, %v494_v43  ;;  %561 = vmatpush.msra.mxu0 %v501_v34 }
 0x2d1   :  { %562 = vmatpush.msra.mxu0 %v496_v38 }
 0x2d3   :  { %563 = vmatpush.msra.mxu0 %v491_v42 }
 0x2d4   :  { %736 = vmatmul.msk.f32.vlgmr.msra.gmra.mxu0 %vm318_vm8, %v538_v16 }
 0x351   :  { %v565_v40 = vpop.f32.mrf.mxu0 }
 0x352   :  { %v566_v45 = vadd.f32 %v565_v40, %v543_v39 }
 0x354   :  { %580 = vrot.lane.b32.xlu0 %v566_v45, %s768_s9  ;;  %593 = vrot.lane.b32.xlu2 %v566_v45, %s775_s25 }
 0x355   :  { %597 = vrot.lane.b32.xlu1 %v566_v45, %s776_s26 }
 0x35c   :  { %568 = vrot.lane.b32.xlu0 %v566_v45, %s778_s28  ;;  %585 = vrot.lane.b32.xlu2 %v566_v45, %s767_s30 }
 0x35d   :  { %589 = vrot.lane.b32.xlu1 %v566_v45, %s774_s24 }
 0x364   :  { %572 = vrot.lane.b32.xlu2 %v566_v45, %s779_s29 }
 0x365   :  { %576 = vrot.lane.b32.xlu1 %v566_v45, %s777_s27 }
 0x36d   :  { %616 = vperm.xlu1 %758, %v612_v7  }
 0x3ae   :  { %v594_v11 = vpop.permute.xlu2 %593 }
 0x3af   :  { %v595_v20 = vmul.f32 %v594_v11, %v1252_v14 }
 0x3b6   :  { %v586_v23 = vpop.permute.xlu2 %585 }
 0x3b7   :  { %v587_v41 = vmul.f32 %v586_v23, %v1259_v22 }
 0x3be   :  { %v573_v47 = vpop.permute.xlu2 %572 }
 0x3bf   :  { %v574_v51 = vmul.f32 %v573_v47, %v1267_v32 }
 0x3c6   :  { %v581_v8 = vpop.permute.xlu0 %580 }
 0x3c7   :  { %v598_v21 = vpop.permute.xlu1 %597  ;;  %v582_v46 = vmul.f32 %v581_v8, %v1261_v26 }
 0x3c8   :  { %v599_v36 = vmul.f32 %v1250_v13, %v598_v21 }
 0x3ca   :  { %637 = vmatpush.msrb.mxu1 %v599_v36 }
 0x3cc   :  { %638 = vmatpush.msrb.mxu1 %v595_v20 }
 0x3ce   :  { %v569_v50 = vpop.permute.xlu0 %568 }
 0x3cf   :  { %v590_v37 = vpop.permute.xlu1 %589  ;;  %v570_v52 = vmul.f32 %v569_v50, %v1269_v33 }
 0x3d0   :  { %v591_v44 = vmul.f32 %v590_v37, %v1254_v18 }
 0x3d2   :  { %639 = vmatpush.msrb.mxu1 %v591_v44 }
 0x3d4   :  { %640 = vmatpush.msrb.mxu1 %v587_v41 }
 0x3d6   :  { %641 = vmatpush.msrb.mxu1 %v566_v45 }
 0x3d7   :  { %v577_v48 = vpop.permute.xlu1 %576 }
 0x3d8   :  { %v578_v49 = vmul.f32 %v577_v48, %v1264_v27  ;;  %642 = vmatpush.msrb.mxu1 %v582_v46 }
 0x3da   :  { %643 = vmatpush.msrb.mxu1 %v578_v49 }
 0x3dc   :  { %644 = vmatpush.msrb.mxu1 %v574_v51 }
 0x3de   :  { %645 = vmatpush.msrb.mxu1 %v570_v52 }
 0x3df   :  { %737 = vmatmul.msk.f32.vlgmr.msrb.gmra.mxu1 %vm318_vm8, %v610_v53  ;;  %v617_v54 = vpop.permute.xlu1 %616 }
 0x3e7   :  { %738 = vmatmul.msk.f32.gmra.mxu1 %vm318_vm8, %v611_v1 }
 0x45c   :  { %v647_v55 = vpop.f32.mrf.mxu1 }
 0x45d   :  { %v648_v56 = vadd.f32 %v647_v55, %v617_v54 }
 0x45f   :  { %v653_v35 = vmax.f32 %v648_v56, 0.0 }
 0x461   :  { %675 = vrot.lane.b32.xlu1 %v653_v35, %s774_s24  ;;  %679 = vrot.lane.b32.xlu0 %v653_v35, %s775_s25 }
 0x462   :  { %683 = vrot.lane.b32.xlu2 %v653_v35, %s776_s26 }
 0x464   :  { %v650_v4 = vpop.f32.mrf.mxu1 }
 0x469   :  { %662 = vrot.lane.b32.xlu1 %v653_v35, %s777_s27  ;;  %666 = vrot.lane.b32.xlu0 %v653_v35, %s768_s9 }
 0x46a   :  { %671 = vrot.lane.b32.xlu2 %v653_v35, %s767_s30 }
 0x471   :  { %621 = vperm.xlu1 %758, %v613_v57   ;;  %654 = vrot.lane.b32.xlu0 %v653_v35, %s778_s28 }
 0x472   :  { %658 = vrot.lane.b32.xlu2 %v653_v35, %s779_s29 }
 0x47a   :  { %700 = vperm.xlu2 %756, %v697_v58  }
 0x4bc   :  { %v684_v59 = vpop.permute.xlu2 %683 }
 0x4bd   :  { %v685_v15 = vmul.f32 %v1250_v13, %v684_v59 }
 0x4bf   :  { %713 = vmatpush.msra.mxu2 %v685_v15 }
 0x4c4   :  { %v672_v60 = vpop.permute.xlu2 %671 }
 0x4c5   :  { %v673_v5 = vmul.f32 %v672_v60, %v1259_v22 }
 0x4cc   :  { %v659_v12 = vpop.permute.xlu2 %658 }
 0x4cd   :  { %v660_v2 = vmul.f32 %v659_v12, %v1267_v32 }
 0x4d3   :  { %v676_v61 = vpop.permute.xlu1 %675  ;;  %v680_v62 = vpop.permute.xlu0 %679 }
 0x4d4   :  { %v681_v63 = vmul.f32 %v680_v62, %v1252_v14  ;;  %v677_v0 = vmul.f32 %v676_v61, %v1254_v18  ;;  %v701_v10 = vpop.permute.xlu2 %700 }
 0x4d6   :  { %714 = vmatpush.msra.mxu2 %v681_v63 }
 0x4d8   :  { %715 = vmatpush.msra.mxu2 %v677_v0 }
 0x4da   :  { %716 = vmatpush.msra.mxu2 %v673_v5 }
 0x4db   :  { %v663_v3 = vpop.permute.xlu1 %662  ;;  %v667_v6 = vpop.permute.xlu0 %666 }
 0x4dc   :  { %v668_v9 = vmul.f32 %v667_v6, %v1261_v26  ;;  %717 = vmatpush.msra.mxu2 %v653_v35  ;;  %v664_v13 = vmul.f32 %v663_v3, %v1264_v27 }
 0x4de   :  { %718 = vmatpush.msra.mxu2 %v668_v9 }
 0x4e0   :  { %719 = vmatpush.msra.mxu2 %v664_v13 }
 0x4e2   :  { %720 = vmatpush.msra.mxu2 %v660_v2 }
 0x4e3   :  { %v655_v14 = vpop.permute.xlu0 %654  ;;  %v622_v17 = vpop.permute.xlu1 %621 }
 0x4e4   :  { %v656_v18 = vmul.f32 %v655_v14, %v1269_v33  ;;  %v651_v24 = vadd.f32 %v650_v4, %v622_v17 }
 0x4e6   :  { %721 = vmatpush.msra.mxu2 %v656_v18 }
 0x4e7   :  { %739 = vmatmul.msk.f32.vlgmr.msra.gmra.mxu2 %vm318_vm8, %v696_v19 }
 0x56a   :  { %v723_v22 = vpop.f32.mrf.mxu2 }
 0x56b   :  { %v724_v25 = vadd.f32 %v723_v22, %v701_v10 }
 0x56d   :  { %v726_v26 = vadd.f32 %v724_v25, %v651_v24 }
 0x56f   :  { %727 = vst [vmem:[%s1340_s6] sm:$0xff] %v726_v26 }

</bundles_post_ra>
